<compile_context>
chip_gen: v7x
topology: tpu7x:2x2x1
jax: 0.10.0
libtpu: 0.0.40
codegen_flags: <defaults>
</compile_context>

<pallas_src>
import math
import jax
import jax.numpy as jnp
from jax.experimental import pallas as pl
from jax.experimental.pallas import tpu as pltpu


def _round_up(n, m):
    return ((n + m - 1) // m) * m


# ----------------------------- Pallas kernel --------------------------------
def aug_kernel(mean_ref, istd_ref, wh_ref, wwt_ref, x_ref, o_ref):
    # grid = (N,): one sample per step; all C channel planes computed here.
    wh = wh_ref[0]        # (Sp, Hp) bf16 — resident for the whole step
    wwt = wwt_ref[0]      # (Wp, Sp) bf16
    C = x_ref.shape[1]    # static; the loop is unrolled at trace time
    for c in range(C):
        img = x_ref[0, c]                                            # (Hp, Wp) bf16
        t = jnp.dot(wh, img, preferred_element_type=jnp.float32)     # (Sp, Wp) f32, MXU
        o = jnp.dot(t.astype(jnp.bfloat16), wwt,
                    preferred_element_type=jnp.float32)              # (Sp, Sp) f32, MXU
        # Per-channel normalize epilogue in f32; scalars read from SMEM.
        o_ref[0, c] = (o - mean_ref[c]) * istd_ref[c]


def simple_augmentation(x, wh, wwt, mean, std):
    """x: (N,C,H,W) f32 in [0,1]; wh: (N,S,H); wwt: (N,W,S); mean/std: (C,)."""
    N, C, H, W = x.shape
    S = wh.shape[1]

    # Lane/contract-dim alignment: pad H, W, S to multiples of 128 (128 is enough on
    # v5e's 4x128^2 MXU; on v6e/v7x the 256-wide array is still well fed at real sizes).
    Hp = _round_up(H, 128)
    Wp = _round_up(W, 128)
    Sp = _round_up(S, 128)

    xp = jnp.pad(x, ((0, 0), (0, 0), (0, Hp - H), (0, Wp - W))).astype(jnp.bfloat16)
    whp = jnp.pad(wh, ((0, 0), (0, Sp - S), (0, Hp - H))).astype(jnp.bfloat16)
    wwtp = jnp.pad(wwt, ((0, 0), (0, Wp - W), (0, Sp - S))).astype(jnp.bfloat16)

    mean = mean.astype(jnp.float32)
    istd = (1.0 / std.astype(jnp.float32))

    # Cost hint for XLA scheduling.
    flops = 2 * N * C * (Sp * Hp * Wp + Sp * Sp * Wp)
    bytes_accessed = (N * C * Hp * Wp * 2 + N * Sp * Hp * 2 + N * Wp * Sp * 2
                      + N * C * Sp * Sp * 4)

    # Per-step VMEM: double-buffered in/out blocks + f32 intermediates; cap at 48 MiB so
    # the same tile stays within v7x's 64 MiB physical VMEM.
    block_bytes = (2 * (C * Hp * Wp * 2 + Sp * Hp * 2 + Wp * Sp * 2)
                   + 2 * C * Sp * Sp * 4
                   + (Sp * Wp + Sp * Sp) * 4)
    vmem_limit = int(min(max(2 * block_bytes, 32 * 1024 * 1024), 48 * 1024 * 1024))

    out_padded = pl.pallas_call(
        aug_kernel,
        out_shape=jax.ShapeDtypeStruct((N, C, Sp, Sp), jnp.float32),
        grid=(N,),
        in_specs=[
            pl.BlockSpec(memory_space=pltpu.MemorySpace.SMEM),        # mean  (C,)
            pl.BlockSpec(memory_space=pltpu.MemorySpace.SMEM),        # 1/std (C,)
            pl.BlockSpec((1, Sp, Hp), lambda n: (n, 0, 0)),           # Wh    (N,Sp,Hp)
            pl.BlockSpec((1, Wp, Sp), lambda n: (n, 0, 0)),           # WwT   (N,Wp,Sp)
            pl.BlockSpec((1, C, Hp, Wp), lambda n: (n, 0, 0, 0)),     # x     (N,C,Hp,Wp)
        ],
        out_specs=pl.BlockSpec((1, C, Sp, Sp), lambda n: (n, 0, 0, 0)),
        compiler_params=pltpu.CompilerParams(
            dimension_semantics=("parallel",),
            vmem_limit_bytes=vmem_limit),
        cost_estimate=pl.CostEstimate(
            flops=flops, transcendentals=0, bytes_accessed=bytes_accessed),
    )(mean, istd, whp, wwtp, xp)

    # Crop the lane padding away (cheap XLA slice in the consumer).
    return out_padded[:, :, :S, :S]


# ------------------------ host-side glue (plain JAX) -------------------------
def _cubic(t, a=-0.5):
    # PIL BICUBIC (Keys cubic, a = -0.5)
    at = jnp.abs(t)
    at2, at3 = at * at, at * at * at
    w1 = (a + 2.0) * at3 - (a + 3.0) * at2 + 1.0
    w2 = a * at3 - 5.0 * a * at2 + 8.0 * a * at - 4.0 * a
    return jnp.where(at <= 1.0, w1, jnp.where(at < 2.0, w2, 0.0))


def _resize_weights(src_size, out_size, start, length):
    """Dense bicubic resampling matrix (out_size, src_size) for a crop
    [start, start+length) of the source axis."""
    j = jnp.arange(out_size, dtype=jnp.float32)
    scale = length / out_size
    src = start + (j + 0.5) * scale - 0.5                 # (out,)
    i = jnp.arange(src_size, dtype=jnp.float32)           # (src,)
    filt_scale = jnp.maximum(scale, 1.0)                  # widen filter when downscaling
    w = _cubic((src[:, None] - i[None, :]) / filt_scale)  # (out, src)
    denom = jnp.sum(w, axis=1, keepdims=True)
    denom = jnp.where(jnp.abs(denom) < 1e-6, 1.0, denom)  # guard degenerate crop rows
    return w / denom                                      # row-normalize (boundary handling)


def build_augmentation_params(key, N, H, W, img_size,
                              scale=(0.2, 1.0), ratio=(3.0 / 4.0, 4.0 / 3.0)):
    """Sample RandomResizedCrop + flip parameters and build interpolation matrices."""
    k1, k2, k3, k4, k5 = jax.random.split(key, 5)
    area = float(H * W)
    # TODO(synk): torchvision retries crop sampling up to 10x with a center-crop
    # fallback; we sample once and clamp, so the crop distribution differs slightly.
    target_area = jax.random.uniform(k1, (N,), minval=scale[0], maxval=scale[1]) * area
    log_ratio = jax.random.uniform(k2, (N,), minval=math.log(ratio[0]),
                                   maxval=math.log(ratio[1]))
    aspect = jnp.exp(log_ratio)
    cw = jnp.clip(jnp.sqrt(target_area * aspect), 1.0, float(W))
    ch = jnp.clip(jnp.sqrt(target_area / aspect), 1.0, float(H))
    top = jax.random.uniform(k3, (N,)) * (H - ch)
    left = jax.random.uniform(k4, (N,)) * (W - cw)
    flip = jax.random.uniform(k5, (N,)) < 0.5

    wh = jax.vmap(lambda t, l: _resize_weights(H, img_size, t, l))(top, ch)    # (N,S,H)
    ww = jax.vmap(lambda t, l: _resize_weights(W, img_size, t, l))(left, cw)   # (N,S,W)
    # RandomHorizontalFlip: reverse the output axis of the width-interp matrix.
    ww = jnp.where(flip[:, None, None], ww[:, ::-1, :], ww)
    wwt = jnp.transpose(ww, (0, 2, 1)).astype(jnp.float32)                     # (N,W,S)
    return wh.astype(jnp.float32), wwt


if __name__ == "__main__":
    N, C, H, W = 2, 3, 16, 16
    IMG_SIZE = 8  # output resolution (RandomResizedCrop target)

    key = jax.random.PRNGKey(0)
    kx, kp = jax.random.split(key)
    # Input image batch, float32 in [0,1] (post-ToTensor convention), NCHW.
    x = jax.random.uniform(kx, (N, C, H, W), dtype=jnp.float32)

    mean = jnp.array([0.485, 0.456, 0.406], dtype=jnp.float32)
    std = jnp.array([0.229, 0.224, 0.225], dtype=jnp.float32)

    wh, wwt = build_augmentation_params(kp, N, H, W, IMG_SIZE)

    out = simple_augmentation(x, wh, wwt, mean, std)
    out = jax.block_until_ready(out)

    assert out.shape == (N, C, IMG_SIZE, IMG_SIZE)
    assert out.dtype == jnp.float32
    assert bool(jnp.all(jnp.isfinite(out)))
    print("KERNEL_OK")
</pallas_src>

<mosaic_0001>
module attributes {stable_mosaic.version = 11 : i64} {
  func.func @aug_kernel(%arg0: i32, %arg1: memref<3xf32, #tpu.memory_space<smem>>, %arg2: memref<3xf32, #tpu.memory_space<smem>>, %arg3: memref<1x128x128xbf16, #tpu.memory_space<vmem>>, %arg4: memref<1x128x128xbf16, #tpu.memory_space<vmem>>, %arg5: memref<1x3x128x128xbf16, #tpu.memory_space<vmem>>, %arg6: memref<1x3x128x128xf32, #tpu.memory_space<vmem>>) attributes {dimension_semantics = [#tpu.dimension_semantics<parallel>], iteration_bounds = array<i64: 2>, scalar_prefetch = 0 : i64, scratch_operands = 0 : i64, tpu.core_type = #tpu.core_type<tc>, window_params = [{transform_indices = @transform_0, window_bounds = array<i64: 3>}, {transform_indices = @transform_1, window_bounds = array<i64: 3>}, {transform_indices = @transform_2, window_bounds = array<i64: 1, 128, 128>}, {transform_indices = @transform_3, window_bounds = array<i64: 1, 128, 128>}, {transform_indices = @transform_4, window_bounds = array<i64: 1, 3, 128, 128>}, {transform_indices = @transform_5, window_bounds = array<i64: 1, 3, 128, 128>}]} {
    %c0 = arith.constant 0 : index
    %c0_0 = arith.constant 0 : index
    %c0_1 = arith.constant 0 : index
    %0 = vector.load %arg3[%c0, %c0_0, %c0_1] : memref<1x128x128xbf16, #tpu.memory_space<vmem>>, vector<1x128x128xbf16>
    %1 = vector.shape_cast %0 : vector<1x128x128xbf16> to vector<128x128xbf16>
    %c0_2 = arith.constant 0 : index
    %c0_3 = arith.constant 0 : index
    %c0_4 = arith.constant 0 : index
    %2 = vector.load %arg4[%c0_2, %c0_3, %c0_4] : memref<1x128x128xbf16, #tpu.memory_space<vmem>>, vector<1x128x128xbf16>
    %3 = vector.shape_cast %2 : vector<1x128x128xbf16> to vector<128x128xbf16>
    %c0_5 = arith.constant 0 : index
    %c0_6 = arith.constant 0 : index
    %c0_7 = arith.constant 0 : index
    %c0_8 = arith.constant 0 : index
    %4 = vector.load %arg5[%c0_5, %c0_6, %c0_7, %c0_8] : memref<1x3x128x128xbf16, #tpu.memory_space<vmem>>, vector<1x1x128x128xbf16>
    %5 = vector.shape_cast %4 : vector<1x1x128x128xbf16> to vector<128x128xbf16>
    %cst = arith.constant dense<0.000000e+00> : vector<128x128xf32>
    %6 = tpu.matmul %1, %5, %cst {dimension_numbers = #tpu.dot_dimension_numbers<[1], [0], [0], [1], [0, 0, 1, 1], [], []>} : vector<128x128xbf16>, vector<128x128xbf16>, vector<128x128xf32> -> vector<128x128xf32>
    %7 = arith.truncf %6 : vector<128x128xf32> to vector<128x128xbf16>
    %cst_9 = arith.constant dense<0.000000e+00> : vector<128x128xf32>
    %8 = tpu.matmul %7, %3, %cst_9 {dimension_numbers = #tpu.dot_dimension_numbers<[1], [0], [0], [1], [0, 0, 1, 1], [], []>} : vector<128x128xbf16>, vector<128x128xbf16>, vector<128x128xf32> -> vector<128x128xf32>
    %c0_10 = arith.constant 0 : index
    %9 = memref.load %arg1[%c0_10] : memref<3xf32, #tpu.memory_space<smem>>
    %10 = vector.broadcast %9 : f32 to vector<128x128xf32>
    %11 = arith.subf %8, %10 : vector<128x128xf32>
    %c0_11 = arith.constant 0 : index
    %12 = memref.load %arg2[%c0_11] : memref<3xf32, #tpu.memory_space<smem>>
    %13 = vector.broadcast %12 : f32 to vector<128x128xf32>
    %14 = arith.mulf %11, %13 : vector<128x128xf32>
    %c0_12 = arith.constant 0 : index
    %c0_13 = arith.constant 0 : index
    %c0_14 = arith.constant 0 : index
    %c0_15 = arith.constant 0 : index
    %15 = vector.load %arg6[%c0_12, %c0_13, %c0_14, %c0_15] : memref<1x3x128x128xf32, #tpu.memory_space<vmem>>, vector<1x1x128x128xf32>
    %16 = vector.shape_cast %15 : vector<1x1x128x128xf32> to vector<128x128xf32>
    %17 = vector.shape_cast %14 : vector<128x128xf32> to vector<1x1x128x128xf32>
    tpu.vector_store %arg6[%c0_12, %c0_13, %c0_14, %c0_15], %17 {strides = array<i32>} : memref<1x3x128x128xf32, #tpu.memory_space<vmem>>, vector<1x1x128x128xf32>,
    %c0_16 = arith.constant 0 : index
    %c1 = arith.constant 1 : index
    %c0_17 = arith.constant 0 : index
    %c0_18 = arith.constant 0 : index
    %18 = vector.load %arg5[%c0_16, %c1, %c0_17, %c0_18] : memref<1x3x128x128xbf16, #tpu.memory_space<vmem>>, vector<1x1x128x128xbf16>
    %19 = vector.shape_cast %18 : vector<1x1x128x128xbf16> to vector<128x128xbf16>
    %cst_19 = arith.constant dense<0.000000e+00> : vector<128x128xf32>
    %20 = tpu.matmul %1, %19, %cst_19 {dimension_numbers = #tpu.dot_dimension_numbers<[1], [0], [0], [1], [0, 0, 1, 1], [], []>} : vector<128x128xbf16>, vector<128x128xbf16>, vector<128x128xf32> -> vector<128x128xf32>
    %21 = arith.truncf %20 : vector<128x128xf32> to vector<128x128xbf16>
    %cst_20 = arith.constant dense<0.000000e+00> : vector<128x128xf32>
    %22 = tpu.matmul %21, %3, %cst_20 {dimension_numbers = #tpu.dot_dimension_numbers<[1], [0], [0], [1], [0, 0, 1, 1], [], []>} : vector<128x128xbf16>, vector<128x128xbf16>, vector<128x128xf32> -> vector<128x128xf32>
    %c1_21 = arith.constant 1 : index
    %23 = memref.load %arg1[%c1_21] : memref<3xf32, #tpu.memory_space<smem>>
    %24 = vector.broadcast %23 : f32 to vector<128x128xf32>
    %25 = arith.subf %22, %24 : vector<128x128xf32>
    %c1_22 = arith.constant 1 : index
    %26 = memref.load %arg2[%c1_22] : memref<3xf32, #tpu.memory_space<smem>>
    %27 = vector.broadcast %26 : f32 to vector<128x128xf32>
    %28 = arith.mulf %25, %27 : vector<128x128xf32>
    %c0_23 = arith.constant 0 : index
    %c1_24 = arith.constant 1 : index
    %c0_25 = arith.constant 0 : index
    %c0_26 = arith.constant 0 : index
    %29 = vector.load %arg6[%c0_23, %c1_24, %c0_25, %c0_26] : memref<1x3x128x128xf32, #tpu.memory_space<vmem>>, vector<1x1x128x128xf32>
    %30 = vector.shape_cast %29 : vector<1x1x128x128xf32> to vector<128x128xf32>
    %31 = vector.shape_cast %28 : vector<128x128xf32> to vector<1x1x128x128xf32>
    tpu.vector_store %arg6[%c0_23, %c1_24, %c0_25, %c0_26], %31 {strides = array<i32>} : memref<1x3x128x128xf32, #tpu.memory_space<vmem>>, vector<1x1x128x128xf32>,
    %c0_27 = arith.constant 0 : index
    %c2 = arith.constant 2 : index
    %c0_28 = arith.constant 0 : index
    %c0_29 = arith.constant 0 : index
    %32 = vector.load %arg5[%c0_27, %c2, %c0_28, %c0_29] : memref<1x3x128x128xbf16, #tpu.memory_space<vmem>>, vector<1x1x128x128xbf16>
    %33 = vector.shape_cast %32 : vector<1x1x128x128xbf16> to vector<128x128xbf16>
    %cst_30 = arith.constant dense<0.000000e+00> : vector<128x128xf32>
    %34 = tpu.matmul %1, %33, %cst_30 {dimension_numbers = #tpu.dot_dimension_numbers<[1], [0], [0], [1], [0, 0, 1, 1], [], []>} : vector<128x128xbf16>, vector<128x128xbf16>, vector<128x128xf32> -> vector<128x128xf32>
    %35 = arith.truncf %34 : vector<128x128xf32> to vector<128x128xbf16>
    %cst_31 = arith.constant dense<0.000000e+00> : vector<128x128xf32>
    %36 = tpu.matmul %35, %3, %cst_31 {dimension_numbers = #tpu.dot_dimension_numbers<[1], [0], [0], [1], [0, 0, 1, 1], [], []>} : vector<128x128xbf16>, vector<128x128xbf16>, vector<128x128xf32> -> vector<128x128xf32>
    %c2_32 = arith.constant 2 : index
    %37 = memref.load %arg1[%c2_32] : memref<3xf32, #tpu.memory_space<smem>>
    %38 = vector.broadcast %37 : f32 to vector<128x128xf32>
    %39 = arith.subf %36, %38 : vector<128x128xf32>
    %c2_33 = arith.constant 2 : index
    %40 = memref.load %arg2[%c2_33] : memref<3xf32, #tpu.memory_space<smem>>
    %41 = vector.broadcast %40 : f32 to vector<128x128xf32>
    %42 = arith.mulf %39, %41 : vector<128x128xf32>
    %c0_34 = arith.constant 0 : index
    %c2_35 = arith.constant 2 : index
    %c0_36 = arith.constant 0 : index
    %c0_37 = arith.constant 0 : index
    %43 = vector.load %arg6[%c0_34, %c2_35, %c0_36, %c0_37] : memref<1x3x128x128xf32, #tpu.memory_space<vmem>>, vector<1x1x128x128xf32>
    %44 = vector.shape_cast %43 : vector<1x1x128x128xf32> to vector<128x128xf32>
    %45 = vector.shape_cast %42 : vector<128x128xf32> to vector<1x1x128x128xf32>
    tpu.vector_store %arg6[%c0_34, %c2_35, %c0_36, %c0_37], %45 {strides = array<i32>} : memref<1x3x128x128xf32, #tpu.memory_space<vmem>>, vector<1x1x128x128xf32>,
    return
  }
  func.func @transform_0(%arg0: i32) -> i32 {
    %c0_i32 = arith.constant 0 : i32
    %c0_i32_0 = arith.constant 0 : i32
    return %c0_i32 : i32
  }
  func.func @transform_1(%arg0: i32) -> i32 {
    %c0_i32 = arith.constant 0 : i32
    %c0_i32_0 = arith.constant 0 : i32
    return %c0_i32 : i32
  }
  func.func @transform_2(%arg0: i32) -> (i32, i32, i32) {
    %c0_i32 = arith.constant 0 : i32
    %c0_i32_0 = arith.constant 0 : i32
    %c0_i32_1 = arith.constant 0 : i32
    return %arg0, %c0_i32, %c0_i32_0 : i32, i32, i32
  }
  func.func @transform_3(%arg0: i32) -> (i32, i32, i32) {
    %c0_i32 = arith.constant 0 : i32
    %c0_i32_0 = arith.constant 0 : i32
    %c0_i32_1 = arith.constant 0 : i32
    return %arg0, %c0_i32, %c0_i32_0 : i32, i32, i32
  }
  func.func @transform_4(%arg0: i32) -> (i32, i32, i32, i32) {
    %c0_i32 = arith.constant 0 : i32
    %c0_i32_0 = arith.constant 0 : i32
    %c0_i32_1 = arith.constant 0 : i32
    %c0_i32_2 = arith.constant 0 : i32
    return %arg0, %c0_i32, %c0_i32_0, %c0_i32_1 : i32, i32, i32, i32
  }
  func.func @transform_5(%arg0: i32) -> (i32, i32, i32, i32) {
    %c0_i32 = arith.constant 0 : i32
    %c0_i32_0 = arith.constant 0 : i32
    %c0_i32_1 = arith.constant 0 : i32
    %c0_i32_2 = arith.constant 0 : i32
    return %arg0, %c0_i32, %c0_i32_0, %c0_i32_1 : i32, i32, i32, i32
  }
}

</mosaic_0001>

<bundles_post_ra>
// kernel: tpu_custom_call.1
= control target key start
LH: loop header
LB: loop body
LE: loop exit
PB: predicated region body
PF: predicated region fallthrough
CT: control target
= control target key end

     0   :  { %s2973_s0 = inlined_call_operand.hbm [shape: f32[3], index: 0, kind: input, shape index: {}]   ;;  %s2974_s1 = inlined_call_operand.vmem [shape: f32[3], index: 1, kind: input, shape index: {}]   ;;  %s2975_s2 = inlined_call_operand.hbm [shape: bf16[2,128,128], index: 2, kind: input, shape index: {}]   ;;  %s2976_s3 = inlined_call_operand.hbm [shape: bf16[2,128,128], index: 3, kind: input, shape index: {}]   ;;  %s2977_s4 = inlined_call_operand.hbm [shape: bf16[2,3,128,128], index: 4, kind: input, shape index: {}]   ;;  %s2978_s5 = inlined_call_operand.hbm [shape: f32[2,3,128,128], index: 5, kind: output, shape index: {}]  }
   0x1   :  { %2990 = sst [smem:[#allocation20_spill]] %s2974_s1 }
   0x2   :  { %2991 = sst [smem:[#allocation21_spill]] %s2975_s2 }
   0x3   :  { %2992 = sst [smem:[#allocation22_spill]] %s2976_s3 }
   0x4   :  { %10 = vsyncpa [#allocation5], 0 }
   0x5   :  { %11 = vsyncpa [#allocation6], 0 }
   0x6   :  { %12 = vsyncpa [#allocation3], 0 }
   0x7   :  { %14 = vsyncpa [#allocation3 + $0x1], 0 }
   0x8   :  { %15 = vsyncpa [#allocation10], 0 }
   0x9   :  { %17 = vsyncpa [#allocation10 + $0x1], 0 }
   0xa   :  { %18 = vsyncpa [#allocation4], 0 }
   0xb   :  { %20 = vsyncpa [#allocation4 + $0x1], 0  ;;  %s2368_s18 = smov 0   ;;  %s2370_s19 = smov 0  }
   0xc   :  { %s2372_s20 = smov 0   ;;  %s2374_s21 = smov 0  }
   0xd LB: > { %2993 = sst [smem:[#allocation18_spill]] %s2322_s20  ;;  %s2389_s22 = sadd.s32 1, %s2326_s21   ;;  %s2326_s21 = sphi %s2374_s21, %s3022_s21   ;;  %s2322_s20 = sphi %s2372_s20, %s3019_s20   ;;  %s2318_s19 = sphi %s2370_s19, %s3021_s19   ;;  %s2314_s18 = sphi %s2368_s18, %s3020_s18  }
   0xe   : > { %s75_s23 = sadd.s32 1, %s2322_s20  ;;  %s72_s24 = ssub.s32 %s2326_s21, %s2389_s22 }
   0xf   : > { %p2979_p0 = scmp.ne.s32.totalorder %s2322_s20, %s2318_s19  ;;  %p73_p1 = scmp.eq.s32.totalorder %s72_s24, 0 }
  0x10   : > { %p83_p2 = scmp.eq.s32.totalorder %s2326_s21, 0  ;;  %p2048_p4 = scmp.lt.s32.totalorder %s2326_s21, 2 }
  0x11   : > { %s2400_s25 = scalar_select %p73_p1, %s2322_s20, %s75_s23  }
  0x12   : > { %p84_p5 = por %p83_p2, %p2979_p0  ;;  %s2406_s26 = sand.u32 1, %s2322_s20  }
  0x13   : > { %2994 = sst [smem:[#allocation19_spill]] %s2400_s25  ;;  %s1591_s27 = sshll.u32 %s2406_s26, 6 }
  0x14   : > { %s1714_s28 = sshll.u32 %s2326_s21, 10  ;;  %p2410_p6 = pnand %p2048_p4, %p84_p5 }
  0x15   : > { %s231_s30 = sand.u32 1, %s2326_s21   ;;  %s2996_s3 = sld [smem:[#allocation22_spill]] }
  0x16   : > { %s235_s9 = scalar_lea.vmem [#allocation9], %s1591_s27  ;;  %s2426_s11 = scalar_lea.sflag [#allocation10], %s231_s30 }
  0x17   : > { %s242_s10 = sshll.u32 %s235_s9, 4  ;;  %p2432_p8 = pneg %p2410_p6  ;;  %s2424_s10 = int_to_ptr.vmem [resolvable:$true] %s242_s10 }
  0x1b   : > { %s2420_s8 = scalar_lea.hbm %s2996_s3, %s1714_s28  ;;  %s2135_s16 = scalar_lea.hbm %s2996_s3, 2048 }
  0x1c   : > { %s2130_s12 = scalar_lea.hbm %s2420_s8, 1024  ;;  %p2136_p11 = scmp.lt.u32.totalorder %s2420_s8, %s2996_s3 }
  0x1d   : > { %p2131_p7 = scmp.ne.s32.totalorder %s2420_s8, %s2130_s12  ;;  %p2137_p12 = scmp.lt.u32.totalorder %s2135_s16, %s2130_s12 }
  0x1e   : > { %p2139_p1 = scmp.lt.u32.totalorder %s2130_s12, %s2420_s8 }
  0x1f   : > { %p2133_p9 = pnand %p2432_p8, %p2131_p7  ;;  %p2138_p13 = por %p2137_p12, %p2136_p11 }
  0x21   : > { %p2134_p10 = pneg %p2133_p9  ;;  %p2140_p2 = por %p2139_p1, %p2138_p13 }
  0x23   : > { %p2141_p4 = pnand %p2140_p2, %p2134_p10 }
  0x25   : > { %2144 = shalt.err (!%p2141_p4)
}
  0x26   : > { %s2145_s24 = scalar_lea.vmem %s2424_s10, 1024  ;;  %s2328_s30 = smov [#allocation9]  }
  0x27   : > { %p2146_p5 = scmp.ne.s32.totalorder %s2424_s10, %s2145_s24  ;;  %s2150_s6 = sshll.u32 %s2328_s30, 4  ;;  %s2151_s6 = int_to_ptr.vmem [resolvable:$false] %s2150_s6 }
  0x28   : > { %s2152_s7 = scalar_lea.vmem %s2151_s6, 2048  ;;  %p2153_p3 = scmp.lt.s32.totalorder %s2424_s10, %s2151_s6 }
  0x29   : > { %p2148_p7 = pnand %p2146_p5, %p2432_p8  ;;  %p2154_p0 = scmp.lt.s32.totalorder %s2152_s7, %s2145_s24 }
  0x2b   : > { %p2149_p9 = pneg %p2148_p7  ;;  %p2155_p11 = por %p2154_p0, %p2153_p3 }
  0x2d   : > { %p2156_p12 = pnand %p2155_p11, %p2149_p9 }
  0x2f   : > { %2159 = shalt.err (!%p2156_p12)
}
  0x30   : > { %s2980_s9 = smov 64   ;;  %s2982_s12 = smov 4  }
  0x31   : > { %2038 = dma.hbm_to_vmem [thread:$0]  (!%p2410_p6), %s2420_s8, 1024, %s2424_s10, %s2426_s11, %s2980_s9, %s2980_s9, %s2982_s12  }
  0x32   : > { %s2460_s14 = sadd.s32 4294967295, %s2326_s21   ;;  %s1586_s15 = sadd.s32 4294967294, %s2326_s21  }
  0x33   : > { %p88_p0 = scmp.ne.s32.totalorder %s2318_s19, %s2314_s18  ;;  %p2984_p3 = scmp.eq.s32.totalorder %s2460_s14, 0 }
  0x34   : > { %p164_p10 = scmp.eq.s32.totalorder %s2460_s14, 1  ;;  %p170_p13 = scmp.eq.s32.totalorder %s1586_s15, 1 }
  0x35   : > { %p2469_p1 = por %p2984_p3, %p88_p0  ;;  %p1587_p2 = scmp.ge.s32.totalorder %s2326_s21, 1 }
  0x36   : > { %p2999_p4 = scmp.ne.s32.totalorder %s2322_s20, %s2318_s19  ;;  %p2481_p7 = por %p170_p13, %p88_p0 }
  0x37   : > { %s2998_s16 = scalar_select %p2469_p1, 1, 0 }
  0x38   : > { %p2477_p5 = por %p164_p10, %p2999_p4  ;;  %p177_p9 = scmp.lt.s32.totalorder %s2326_s21, 3 }
  0x39   : > { %s3001_s10 = scalar_select %p2481_p7, 1, 0 }
  0x3a   : > { %s3000_s8 = scalar_select %p2477_p5, 1, 0 }
  0x3b   : > { %s3002_s1 = sld [smem:[#allocation20_spill]]  ;;  %p2489_p11 = pnand %p1587_p2, %p177_p9 }
  0x3c   : > { %s3004_s2 = sld [smem:[#allocation21_spill]]  ;;  %s214_s17 = scalar_lea.vmem [#allocation8], %s1591_s27 }
  0x3d   : > { %s3003_s30 = scalar_select %p2489_p11, 1, 0 }
  0x3e   : > { %p2025_p12 = pneg %p2489_p11  ;;  %s221_s23 = sshll.u32 %s214_s17, 4  ;;  %s2512_s23 = int_to_ptr.vmem [resolvable:$true] %s221_s23 }
  0x3f   : > { %s211_s12 = scalar_lea.sflag [#allocation3], %s2406_s26 }
  0x40   : > { %p2508_p0 = pnand %p2025_p12, %p2984_p3 }
  0x41   : > { %s199_s24 = sshll.u32 %s3002_s1, 4  ;;  %s2493_s24 = int_to_ptr.vmem [resolvable:$true] %s199_s24 }
  0x42   : > { %s2502_s15 = scalar_lea.hbm %s3004_s2, %s1714_s28  ;;  %s2165_s7 = scalar_lea.hbm %s3004_s2, 2048 }
  0x43   : > { %s3005_s9 = scalar_select %p2508_p0, 1, 0 }
  0x44   : > { %s2160_s1 = scalar_lea.hbm %s2502_s15, 1024  ;;  %p2166_p4 = scmp.lt.u32.totalorder %s2502_s15, %s3004_s2 }
  0x45   : > { %p2161_p10 = scmp.ne.s32.totalorder %s2502_s15, %s2160_s1  ;;  %p2167_p9 = scmp.lt.u32.totalorder %s2165_s7, %s2160_s1 }
  0x46   : > { %p2169_p3 = scmp.lt.u32.totalorder %s2160_s1, %s2502_s15 }
  0x47   : > { %p2163_p13 = pnand %p2161_p10, %p2432_p8  ;;  %p2168_p12 = por %p2167_p9, %p2166_p4 }
  0x49   : > { %p2164_p2 = pneg %p2163_p13  ;;  %p2170_p7 = por %p2169_p3, %p2168_p12 }
  0x4b   : > { %p2171_p5 = pnand %p2170_p7, %p2164_p2 }
  0x4d   : > { %2174 = shalt.err (!%p2171_p5)
}
  0x4e   : > { %s2175_s17 = scalar_lea.vmem %s2512_s23, 1024  ;;  %s2331_s28 = smov [#allocation8]  }
  0x4f   : > { %p2176_p10 = scmp.ne.s32.totalorder %s2512_s23, %s2175_s17  ;;  %s2180_s6 = sshll.u32 %s2331_s28, 4  ;;  %s2181_s6 = int_to_ptr.vmem [resolvable:$false] %s2180_s6 }
  0x50   : > { %s2182_s3 = scalar_lea.vmem %s2181_s6, 2048  ;;  %p2183_p11 = scmp.lt.s32.totalorder %s2512_s23, %s2181_s6 }
  0x51   : > { %p2178_p13 = pnand %p2176_p10, %p2432_p8  ;;  %p2184_p0 = scmp.lt.s32.totalorder %s2182_s3, %s2175_s17 }
  0x53   : > { %p2179_p1 = pneg %p2178_p13  ;;  %p2185_p4 = por %p2184_p0, %p2183_p11 }
  0x55   : > { %p2186_p9 = pnand %p2185_p4, %p2179_p1 }
  0x57   : > { %2189 = shalt.err (!%p2186_p9)
}
  0x58   : > { %s3006_s1 = smov 4   ;;  %s3007_s7 = smov 64  }
  0x59   : > { %2035 = dma.hbm_to_vmem [thread:$0]  (!%p2410_p6), %s2502_s15, 1024, %s2512_s23, %s211_s12, %s3007_s7, %s3007_s7, %s3006_s1  }
  0x5a   : > { %s2004_s27 = smul.u32 192, %s2406_s26  ;;  %s2190_s17 = scalar_lea.hbm %s2973_s0, 16 }
  0x5b   : > { %p2191_p3 = scmp.ne.s32.totalorder %s2973_s0, %s2190_s17  ;;  %p3008_p1 = scmp.ne.s32.totalorder %s3005_s9, 0 }
  0x5c   : > { %p2197_p0 = scmp.lt.u32.totalorder %s2190_s17, %s2973_s0 }
  0x5d   : > { %p2192_p5 = pneg %p3008_p1 }
  0x5f   : > { %p2193_p7 = pnand %p2192_p5, %p2191_p3 }
  0x61   : > { %p2194_p11 = pneg %p2193_p7 }
  0x63   : > { %p2199_p2 = pnand %p2197_p0, %p2194_p11 }
  0x65   : > { %2202 = shalt.err (!%p2199_p2)
}
  0x66   : > { %s2332_s12 = smov [#allocation2]   ;;  %s2203_s15 = scalar_lea.vmem %s2493_s24, 16 }
  0x67   : > { %2028 = dma.hbm_to_smem (!%p3008_p1), %s2973_s0, 16, %s2332_s12, [#allocation5]  }
  0x68   : > { %p2204_p12 = scmp.ne.s32.totalorder %s2493_s24, %s2203_s15  ;;  %p2211_p4 = scmp.lt.s32.totalorder %s2493_s24, %s2493_s24 }
  0x69   : > { %p2212_p9 = scmp.lt.s32.totalorder %s2203_s15, %s2203_s15 }
  0x6a   : > { %p2206_p10 = pnand %p2204_p12, %p2192_p5 }
  0x6b   : > { %p2213_p3 = por %p2212_p9, %p2211_p4 }
  0x6c   : > { %p2207_p13 = pneg %p2206_p10 }
  0x6e   : > { %p2214_p7 = pnand %p2213_p3, %p2207_p13 }
  0x70   : > { %2217 = shalt.err (!%p2214_p7)
}
  0x71   : > { %s2333_s20 = smov [#allocation7]   ;;  %s2005_s25 = smul.u32 3072, %s2326_s21 }
  0x72   : > { %2031 = dma.vmem_to_smem (!%p3008_p1), %s2493_s24, 16, %s2333_s20, [#allocation6]  }
  0x73   : > { %s256_s23 = scalar_lea.vmem [#allocation11], %s2004_s27  ;;  %s2569_s3 = scalar_lea.hbm %s2977_s4, %s2005_s25 }
  0x74   : > { %s263_s28 = sshll.u32 %s256_s23, 4  ;;  %s2218_s12 = scalar_lea.hbm %s2569_s3, 3072  ;;  %s2571_s28 = int_to_ptr.vmem [resolvable:$true] %s263_s28 }
  0x75   : > { %p2219_p5 = scmp.ne.s32.totalorder %s2569_s3, %s2218_s12  ;;  %s2223_s27 = scalar_lea.hbm %s2977_s4, 6144 }
  0x76   : > { %p2224_p1 = scmp.lt.u32.totalorder %s2569_s3, %s2977_s4  ;;  %p2225_p2 = scmp.lt.u32.totalorder %s2223_s27, %s2218_s12 }
  0x77   : > { %p2221_p11 = pnand %p2219_p5, %p2432_p8  ;;  %p2227_p10 = scmp.lt.u32.totalorder %s2218_s12, %s2569_s3 }
  0x78   : > { %p2226_p12 = por %p2225_p2, %p2224_p1 }
  0x79   : > { %p2222_p0 = pneg %p2221_p11 }
  0x7a   : > { %p2228_p13 = por %p2227_p10, %p2226_p12 }
  0x7c   : > { %p2229_p4 = pnand %p2228_p13, %p2222_p0 }
  0x7e   : > { %2232 = shalt.err (!%p2229_p4)
}
  0x7f   : > { %s2233_s15 = scalar_lea.vmem %s2571_s28, 3072  ;;  %s2334_s20 = smov [#allocation11]  }
  0x80   : > { %p2234_p9 = scmp.ne.s32.totalorder %s2571_s28, %s2233_s15  ;;  %s2238_s25 = sshll.u32 %s2334_s20, 4  ;;  %s2239_s25 = int_to_ptr.vmem [resolvable:$false] %s2238_s25 }
  0x81   : > { %s2240_s23 = scalar_lea.vmem %s2239_s25, 6144  ;;  %p2241_p5 = scmp.lt.s32.totalorder %s2571_s28, %s2239_s25 }
  0x82   : > { %p2236_p3 = pnand %p2234_p9, %p2432_p8  ;;  %p2242_p11 = scmp.lt.s32.totalorder %s2240_s23, %s2233_s15 }
  0x84   : > { %p2237_p7 = pneg %p2236_p3  ;;  %p2243_p1 = por %p2242_p11, %p2241_p5 }
  0x86   : > { %p2244_p2 = pnand %p2243_p1, %p2237_p7 }
  0x88   : > { %2247 = shalt.err (!%p2244_p2)
}
  0x89   : > { %2041 = dma.hbm_to_vmem [thread:$0]  (!%p2410_p6), %s2569_s3, 3072, %s2571_s28, %s2426_s11, %s3007_s7, %s3007_s7, %s3006_s1  }
  0x8a   : > { %p3009_p8 = scmp.ne.s32.totalorder %s3003_s30, 0 }
  0x8b   : > { %p3010_p0 = scmp.eq.s32.totalorder (!%p3009_p8), %s2460_s14, 0 }
  0x8c   : > { %275 = sbr.rel (%p3009_p8) target bundleno = 735 (0x2df), region = 40 }
  0x93   : > { %2293 = dma.done.wait (%p3010_p0), [#allocation5], 16   ;;  %p3011_p12 = pmov %p3010_p0 }
  0x94   : > { %p3012_p10 = pmov %p3010_p0 }
  0x95   : > { %2295 = vsyncadd (%p3011_p12), [#allocation5], 4294967280 }
  0x96   : > { %2297 = dma.done.wait (%p3012_p10), [#allocation6], 16   ;;  %p3013_p13 = pmov %p3010_p0 }
  0x97   : > { %s2609_s29 = sand.u32 1, %s2318_s19   ;;  %p3014_p6 = scmp.ne.s32.totalorder %s2998_s16, 0 }
  0x98   : > { %2299 = vsyncadd (%p3013_p13), [#allocation6], 4294967280  ;;  %s1601_s11 = sshll.u32 %s2609_s29, 6  ;;  %s286_s13 = scalar_lea.sflag [#allocation3], %s2609_s29 }
  0x99   : > { %s2613_s30 = scalar_lea.vmem [#allocation8], %s1601_s11 }
  0x9a   : > { %2301 = dma.done.wait (%p3014_p6), %s286_s13, 1024  }
  0x9b   : > { %2303 = vsyncadd (%p3014_p6), %s286_s13, 4294966272  ;;  %s294_s1 = sand.u32 1, %s2460_s14   ;;  %s2620_s28 = scalar_lea.vmem [#allocation9], %s1601_s11 }
  0x9c   : > { %s295_s7 = scalar_lea.sflag [#allocation10], %s294_s1 }
  0x9d   : > { %2305 = dma.done.wait (%p3014_p6), %s295_s7, 4096  }
  0x9e   : > { %2307 = vsyncadd (%p3014_p6), %s295_s7, 4294963200  ;;  %s2006_s17 = smul.u32 192, %s2609_s29 }
  0xa0   : > { %s2627_s6 = scalar_lea.vmem [#allocation11], %s2006_s17 }
  0xa1   : > { %312 = sfence }
  0xa2   : > { %v2090_v0 = vld [vmem:[%s2627_s6] sm:$0xff]   ;;  %v2091_v1 = vld [vmem:[%s2627_s6 + $0x8] sm:$0xff]   ;;  %v2092_v2 = vld [vmem:[%s2627_s6 + $0x10] sm:$0xff]   ;;  %s740_s16 = sld [smem:[#allocation2]]  ;;  %s2007_s12 = smul.u32 384, %s2609_s29 }
  0xa3   : > { %1812 = vmatprep.subr.bf16.mxu0 %v2090_v0  ;;  %v2093_v3 = vld [vmem:[%s2627_s6 + $0x18] sm:$0xff]   ;;  %v2634_v4 = vld [vmem:[%s2613_s30] sm:$0xff]   ;;  %v2095_v6 = vld [vmem:[%s2627_s6 + $0x28] sm:$0xff]   ;;  %s758_s3 = sld [smem:[#allocation7]]  ;;  %s1651_s24 = sld [smem:[#allocation2 + $0x1]] }
  0xa4   : > { %1813 = vmatpush3.bf16.msra.mxu0 %v2090_v0  ;;  %1828 = vmatprep.mubr.bf16.mxu0 %v2634_v4  ;;  %v2094_v5 = vld [vmem:[%s2627_s6 + $0x20] sm:$0xff]   ;;  %v2096_v7 = vld [vmem:[%s2627_s6 + $0x30] sm:$0xff]   ;;  %v2097_v8 = vld [vmem:[%s2627_s6 + $0x38] sm:$0xff]   ;;  %s2774_s9 = scalar_lea.vmem [#allocation12], %s2007_s12  ;;  %s1652_s27 = sld [smem:[#allocation7 + $0x1]] }
  0xa5   : > { %1814 = vmatprep.subr.bf16.mxu0 %v2091_v1  ;;  %v2100_v9 = vld [vmem:[%s2627_s6 + $0x40] sm:$0xff]   ;;  %v2643_v10 = vld [vmem:[%s2613_s30 + $0x8] sm:$0xff]   ;;  %v2647_v12 = vld [vmem:[%s2613_s30 + $0x10] sm:$0xff]   ;;  %s1693_s26 = sld [smem:[#allocation2 + $0x2]]  ;;  %s2008_s15 = smul.u32 6144, %s2460_s14 }
  0xa6   : > { %v2101_v11 = vld [vmem:[%s2627_s6 + $0x48] sm:$0xff]   ;;  %v2650_v13 = vld [vmem:[%s2620_s28] sm:$0xff]   ;;  %v2104_v15 = vld [vmem:[%s2627_s6 + $0x50] sm:$0xff]   ;;  %s1694_s2 = sld [smem:[#allocation7 + $0x2]]  ;;  %s1446_s20 = sshll.u32 %s2774_s9, 4  ;;  %s2925_s20 = int_to_ptr.vmem [resolvable:$true] %s1446_s20 }
  0xa7   : > { %v2653_v14 = vld [vmem:[%s2620_s28 + $0x8] sm:$0xff]   ;;  %1844 = vmatprep.subr.bf16.mxu1 %v2650_v13  ;;  %v2662_v16 = vld [vmem:[%s2620_s28 + $0x10] sm:$0xff]   ;;  %v2665_v17 = vld [vmem:[%s2613_s30 + $0x18] sm:$0xff]   ;;  %s2923_s23 = scalar_lea.hbm %s2978_s5, %s2008_s15  ;;  %s1433_s11 = scalar_lea.sflag [#allocation4], %s2609_s29 }
  0xa8   : > { %1815 = vmatpush3.bf16.msra.mxu0 %v2091_v1  ;;  %1845 = vmatpush3.bf16.msra.mxu1 %v2650_v13  ;;  %v2668_v18 = vld [vmem:[%s2613_s30 + $0x20] sm:$0xff]   ;;  %v2105_v19 = vld [vmem:[%s2627_s6 + $0x58] sm:$0xff]   ;;  %v2685_v23 = vld [vmem:[%s2613_s30 + $0x28] sm:$0xff]   ;;  %s2248_s13 = scalar_lea.vmem %s2925_s20, 6144  ;;  %p3015_p9 = scmp.ne.s32.totalorder %s3000_s8, 0 }
  0xa9   : > { %1816 = vmatprep.subr.bf16.mxu0 %v2092_v2  ;;  %1846 = vmatprep.subr.bf16.mxu1 %v2653_v14  ;;  %v2674_v20 = vld [vmem:[%s2620_s28 + $0x18] sm:$0xff]   ;;  %v2108_v21 = vld [vmem:[%s2627_s6 + $0x60] sm:$0xff]   ;;  %v2110_v24 = vld [vmem:[%s2613_s30 + $0x30] sm:$0xff]   ;;  %p2249_p4 = scmp.ne.s32.totalorder %s2925_s20, %s2248_s13 }
  0xaa   : > { %v2682_v22 = vld [vmem:[%s2620_s28 + $0x20] sm:$0xff]   ;;  %v2109_v25 = vld [vmem:[%s2627_s6 + $0x68] sm:$0xff]   ;;  %v2112_v27 = vld [vmem:[%s2627_s6 + $0x70] sm:$0xff]  }
  0xab   : > { %v2692_v26 = vld [vmem:[%s2620_s28 + $0x28] sm:$0xff]   ;;  %v2699_v28 = vld [vmem:[%s2620_s28 + $0x30] sm:$0xff]   ;;  %v2111_v29 = vld [vmem:[%s2613_s30 + $0x38] sm:$0xff]   ;;  %p2250_p3 = pnand %p2249_p4, %p3015_p9  ;;  %s2335_s30 = smov [#allocation12]  }
  0xac   : > { %1817 = vmatpush3.bf16.msra.mxu0 %v2092_v2  ;;  %1847 = vmatpush3.bf16.msra.mxu1 %v2653_v14  ;;  %v2113_v30 = vld [vmem:[%s2627_s6 + $0x78] sm:$0xff]   ;;  %v2114_v31 = vld [vmem:[%s2627_s6 + $0x80] sm:$0xff]   ;;  %v2115_v32 = vld [vmem:[%s2627_s6 + $0x88] sm:$0xff]   ;;  %s2252_s1 = sshll.u32 %s2335_s30, 4  ;;  %s2253_s1 = int_to_ptr.vmem [resolvable:$false] %s2252_s1 }
  0xad   : > { %1818 = vmatprep.subr.bf16.mxu0 %v2093_v3  ;;  %1848 = vmatprep.subr.bf16.mxu1 %v2662_v16  ;;  %v2116_v33 = vld [vmem:[%s2627_s6 + $0x90] sm:$0xff]   ;;  %v2117_v34 = vld [vmem:[%s2627_s6 + $0x98] sm:$0xff]   ;;  %v2118_v35 = vld [vmem:[%s2627_s6 + $0xa0] sm:$0xff]   ;;  %p2251_p7 = pneg %p2250_p3  ;;  %s2254_s7 = scalar_lea.vmem %s2253_s1, 12288 }
  0xae   : > { %v2119_v36 = vld [vmem:[%s2627_s6 + $0xa8] sm:$0xff]   ;;  %v2120_v37 = vld [vmem:[%s2627_s6 + $0xb0] sm:$0xff]   ;;  %v2121_v38 = vld [vmem:[%s2627_s6 + $0xb8] sm:$0xff]   ;;  %p2255_p5 = scmp.lt.s32.totalorder %s2925_s20, %s2253_s1  ;;  %p2256_p11 = scmp.lt.s32.totalorder %s2254_s7, %s2248_s13 }
  0xaf   : > { %v2727_v39 = vld [vmem:[%s2620_s28 + $0x38] sm:$0xff]  }
  0xb0   : > { %1819 = vmatpush3.bf16.msra.mxu0 %v2093_v3  ;;  %1849 = vmatpush3.bf16.msra.mxu1 %v2662_v16  ;;  %p2257_p1 = por %p2256_p11, %p2255_p5 }
  0xb1   : > { %1820 = vmatprep.subr.bf16.mxu0 %v2094_v5  ;;  %1850 = vmatprep.subr.bf16.mxu1 %v2674_v20 }
  0xb2   : > { %p2258_p2 = pnand %p2257_p1, %p2251_p7 }
  0xb4   : > { %1821 = vmatpush3.bf16.msra.mxu0 %v2094_v5  ;;  %1851 = vmatpush3.bf16.msra.mxu1 %v2674_v20 }
  0xb5   : > { %1822 = vmatprep.subr.bf16.mxu0 %v2095_v6  ;;  %1852 = vmatprep.subr.bf16.mxu1 %v2682_v22 }
  0xb8   : > { %1823 = vmatpush3.bf16.msra.mxu0 %v2095_v6  ;;  %1853 = vmatpush3.bf16.msra.mxu1 %v2682_v22 }
  0xb9   : > { %1824 = vmatprep.subr.bf16.mxu0 %v2096_v7  ;;  %1854 = vmatprep.subr.bf16.mxu1 %v2692_v26 }
  0xbc   : > { %1825 = vmatpush3.bf16.msra.mxu0 %v2096_v7  ;;  %1855 = vmatpush3.bf16.msra.mxu1 %v2692_v26 }
  0xbd   : > { %1826 = vmatprep.subr.bf16.mxu0 %v2097_v8  ;;  %1856 = vmatprep.subr.bf16.mxu1 %v2699_v28 }
  0xc0   : > { %1827 = vmatpush3.bf16.msra.mxu0 %v2097_v8  ;;  %1857 = vmatpush3.bf16.msra.mxu1 %v2699_v28 }
  0xc1   : > { %1876 = vmatprep.subr.bf16.mxu0 %v2100_v9  ;;  %1858 = vmatprep.subr.bf16.mxu1 %v2727_v39 }
  0xc3   : > { %1829 = vmatmul.mubr.bf16.vlgmr.msra.gmra.mrb[0].mxu0 %v2643_v10 }
  0xc4   : > { %1877 = vmatpush3.bf16.msra.mxu0 %v2100_v9  ;;  %1832 = vmatprep.mubr.bf16.mxu0 %v2647_v12 }
  0xc5   : > { %1878 = vmatprep.subr.bf16.mxu0 %v2101_v11  ;;  %1859 = vmatpush3.bf16.msra.mxu1 %v2727_v39 }
  0xc6   : > { %1908 = vmatprep.subr.bf16.mxu1 %v2650_v13 }
  0xc8   : > { %1879 = vmatpush3.bf16.msra.mxu0 %v2101_v11 }
  0xc9   : > { %1880 = vmatprep.subr.bf16.mxu0 %v2104_v15 }
  0xcb   : > { %1833 = vmatmul.mubr.bf16.gmra.mrb[4].mxu0 %v2665_v17 }
  0xcc   : > { %1881 = vmatpush3.bf16.msra.mxu0 %v2104_v15  ;;  %1836 = vmatprep.mubr.bf16.mxu0 %v2668_v18 }
  0xcd   : > { %1882 = vmatprep.subr.bf16.mxu0 %v2105_v19 }
  0xd0   : > { %1883 = vmatpush3.bf16.msra.mxu0 %v2105_v19 }
  0xd1   : > { %1884 = vmatprep.subr.bf16.mxu0 %v2108_v21 }
  0xd3   : > { %1837 = vmatmul.mubr.bf16.gmra.mrb[8].mxu0 %v2685_v23 }
  0xd4   : > { %1885 = vmatpush3.bf16.msra.mxu0 %v2108_v21  ;;  %1840 = vmatprep.mubr.bf16.mxu0 %v2110_v24 }
  0xd5   : > { %1886 = vmatprep.subr.bf16.mxu0 %v2109_v25 }
  0xd8   : > { %1887 = vmatpush3.bf16.msra.mxu0 %v2109_v25 }
  0xd9   : > { %1888 = vmatprep.subr.bf16.mxu0 %v2112_v27 }
  0xdb   : > { %1841 = vmatmul.mubr.bf16.gmra.mrb[12].mxu0 %v2111_v29 }
  0xdc   : > { %1889 = vmatpush3.bf16.msra.mxu0 %v2112_v27  ;;  %1892 = vmatprep.mubr.bf16.mxu0 %v2634_v4 }
  0xdd   : > { %1890 = vmatprep.subr.bf16.mxu0 %v2113_v30 }
  0xe0   : > { %1891 = vmatpush3.bf16.msra.mxu0 %v2113_v30 }
  0xe1   : > { %1940 = vmatprep.subr.bf16.mxu0 %v2114_v31 }
  0xe3   : > { %1893 = vmatmul.mubr.bf16.vlgmr.msra.gmra.mrb[16].mxu0 %v2643_v10 }
  0xe4   : > { %1941 = vmatpush3.bf16.msra.mxu0 %v2114_v31  ;;  %1896 = vmatprep.mubr.bf16.mxu0 %v2647_v12 }
  0xe5   : > { %1942 = vmatprep.subr.bf16.mxu0 %v2115_v32 }
  0xe8   : > { %1943 = vmatpush3.bf16.msra.mxu0 %v2115_v32 }
  0xe9   : > { %1944 = vmatprep.subr.bf16.mxu0 %v2116_v33 }
  0xeb   : > { %1897 = vmatmul.mubr.bf16.gmra.mrb[20].mxu0 %v2665_v17 }
  0xec   : > { %1945 = vmatpush3.bf16.msra.mxu0 %v2116_v33  ;;  %1900 = vmatprep.mubr.bf16.mxu0 %v2668_v18 }
  0xed   : > { %1946 = vmatprep.subr.bf16.mxu0 %v2117_v34 }
  0xf0   : > { %1947 = vmatpush3.bf16.msra.mxu0 %v2117_v34 }
  0xf1   : > { %1948 = vmatprep.subr.bf16.mxu0 %v2118_v35 }
  0xf3   : > { %1901 = vmatmul.mubr.bf16.gmra.mrb[24].mxu0 %v2685_v23 }
  0xf4   : > { %1949 = vmatpush3.bf16.msra.mxu0 %v2118_v35  ;;  %1904 = vmatprep.mubr.bf16.mxu0 %v2110_v24 }
  0xf5   : > { %1950 = vmatprep.subr.bf16.mxu0 %v2119_v36 }
  0xf8   : > { %1951 = vmatpush3.bf16.msra.mxu0 %v2119_v36 }
  0xf9   : > { %1952 = vmatprep.subr.bf16.mxu0 %v2120_v37 }
  0xfb   : > { %1905 = vmatmul.mubr.bf16.gmra.mrb[28].mxu0 %v2111_v29 }
  0xfc   : > { %1953 = vmatpush3.bf16.msra.mxu0 %v2120_v37  ;;  %1956 = vmatprep.mubr.bf16.mxu0 %v2634_v4 }
  0xfd   : > { %1954 = vmatprep.subr.bf16.mxu0 %v2121_v38 }
 0x100   : > { %1955 = vmatpush3.bf16.msra.mxu0 %v2121_v38 }
 0x103   : > { %1957 = vmatmul.mubr.bf16.vlgmr.msra.gmra.mrb[32].mxu0 %v2643_v10 }
 0x104   : > { %1960 = vmatprep.mubr.bf16.mxu0 %v2647_v12 }
 0x10b   : > { %1961 = vmatmul.mubr.bf16.gmra.mrb[36].mxu0 %v2665_v17 }
 0x10c   : > { %1964 = vmatprep.mubr.bf16.mxu0 %v2668_v18 }
 0x113   : > { %1965 = vmatmul.mubr.bf16.gmra.mrb[40].mxu0 %v2685_v23 }
 0x114   : > { %1968 = vmatprep.mubr.bf16.mxu0 %v2110_v24 }
 0x11b   : > { %1969 = vmatmul.mubr.bf16.gmra.mrb[44].mxu0 %v2111_v29 }
 0x196   : > { %v1830_v40 = vpop.f32.mrb[0].mxu0 }
 0x197   : > { %v524_v41 = vpop.f32.mrb[1].mxu0 }
 0x198   : > { %v1831_v42 = vpop.f32.mrb[2].mxu0 }
 0x199   : > { %v588_v43 = vpack.c.bf16 %v1831_v42, %v1830_v40  ;;  %v527_v44 = vpop.f32.mrb[3].mxu0 }
 0x19a   : > { %v587_v45 = vpack.c.bf16 %v527_v44, %v524_v41 }
 0x19c   : > { %1860 = vmatprep.mubr.bf16.mxu1 %v587_v45 }
 0x19d   : > { %1861 = vmatmul.mubr.bf16.vlgmr.msra.gmra.mrb[0].mxu1 %v588_v43 }
 0x19e   : > { %v1834_v46 = vpop.f32.mrb[4].mxu0  ;;  %1909 = vmatpush3.bf16.msra.mxu1 %v2650_v13 }
 0x19f   : > { %v540_v47 = vpop.f32.mrb[5].mxu0  ;;  %1910 = vmatprep.subr.bf16.mxu1 %v2653_v14 }
 0x1a0   : > { %v1835_v48 = vpop.f32.mrb[6].mxu0 }
 0x1a1   : > { %v590_v49 = vpack.c.bf16 %v1835_v48, %v1834_v46  ;;  %v543_v50 = vpop.f32.mrb[7].mxu0  ;;  %v2764_v48 = vstv %s740_s16 }
 0x1a2   : > { %v589_v51 = vpack.c.bf16 %v543_v50, %v540_v47  ;;  %1911 = vmatpush3.bf16.msra.mxu1 %v2653_v14  ;;  %v2766_v50 = vstv %s758_s3 }
 0x1a3   : > { %1912 = vmatprep.subr.bf16.mxu1 %v2662_v16 }
 0x1a4   : > { %1864 = vmatprep.mubr.bf16.mxu1 %v589_v51 }
 0x1a5   : > { %1865 = vmatmul.mubr.bf16.gmra.mrb[4].mxu1 %v590_v49 }
 0x1a6   : > { %v1838_v52 = vpop.f32.mrb[8].mxu0  ;;  %1913 = vmatpush3.bf16.msra.mxu1 %v2662_v16 }
 0x1a7   : > { %v556_v53 = vpop.f32.mrb[9].mxu0  ;;  %1914 = vmatprep.subr.bf16.mxu1 %v2674_v20 }
 0x1a8   : > { %v1839_v54 = vpop.f32.mrb[10].mxu0 }
 0x1a9   : > { %v592_v55 = vpack.c.bf16 %v1839_v54, %v1838_v52  ;;  %v559_v56 = vpop.f32.mrb[11].mxu0 }
 0x1aa   : > { %v591_v57 = vpack.c.bf16 %v559_v56, %v556_v53  ;;  %1915 = vmatpush3.bf16.msra.mxu1 %v2674_v20 }
 0x1ab   : > { %1916 = vmatprep.subr.bf16.mxu1 %v2682_v22 }
 0x1ac   : > { %1868 = vmatprep.mubr.bf16.mxu1 %v591_v57 }
 0x1ad   : > { %1869 = vmatmul.mubr.bf16.gmra.mrb[8].mxu1 %v592_v55 }
 0x1ae   : > { %v1842_v58 = vpop.f32.mrb[12].mxu0  ;;  %1917 = vmatpush3.bf16.msra.mxu1 %v2682_v22 }
 0x1af   : > { %v572_v59 = vpop.f32.mrb[13].mxu0  ;;  %1918 = vmatprep.subr.bf16.mxu1 %v2692_v26 }
 0x1b0   : > { %v1843_v60 = vpop.f32.mrb[14].mxu0 }
 0x1b1   : > { %v594_v61 = vpack.c.bf16 %v1843_v60, %v1842_v58  ;;  %v575_v62 = vpop.f32.mrb[15].mxu0 }
 0x1b2   : > { %v593_v63 = vpack.c.bf16 %v575_v62, %v572_v59  ;;  %1919 = vmatpush3.bf16.msra.mxu1 %v2692_v26 }
 0x1b3   : > { %1920 = vmatprep.subr.bf16.mxu1 %v2699_v28 }
 0x1b4   : > { %1872 = vmatprep.mubr.bf16.mxu1 %v593_v63 }
 0x1b5   : > { %1873 = vmatmul.mubr.bf16.gmra.mrb[12].mxu1 %v594_v61 }
 0x1b6   : > { %v1894_v0 = vpop.f32.mrb[16].mxu0  ;;  %1921 = vmatpush3.bf16.msra.mxu1 %v2699_v28 }
 0x1b7   : > { %v891_v1 = vpop.f32.mrb[17].mxu0  ;;  %1922 = vmatprep.subr.bf16.mxu1 %v2727_v39 }
 0x1b8   : > { %v1895_v2 = vpop.f32.mrb[18].mxu0 }
 0x1b9   : > { %v955_v3 = vpack.c.bf16 %v1895_v2, %v1894_v0  ;;  %v894_v4 = vpop.f32.mrb[19].mxu0 }
 0x1ba   : > { %v954_v5 = vpack.c.bf16 %v894_v4, %v891_v1  ;;  %1923 = vmatpush3.bf16.msra.mxu1 %v2727_v39 }
 0x1bb   : > { %1972 = vmatprep.subr.bf16.mxu1 %v2650_v13 }
 0x1bc   : > { %1924 = vmatprep.mubr.bf16.mxu1 %v954_v5 }
 0x1bd   : > { %1925 = vmatmul.mubr.bf16.vlgmr.msra.gmra.mrb[16].mxu1 %v955_v3 }
 0x1be   : > { %v1898_v6 = vpop.f32.mrb[20].mxu0  ;;  %1973 = vmatpush3.bf16.msra.mxu1 %v2650_v13 }
 0x1bf   : > { %v907_v7 = vpop.f32.mrb[21].mxu0  ;;  %1974 = vmatprep.subr.bf16.mxu1 %v2653_v14 }
 0x1c0   : > { %v1899_v8 = vpop.f32.mrb[22].mxu0 }
 0x1c1   : > { %v957_v9 = vpack.c.bf16 %v1899_v8, %v1898_v6  ;;  %v910_v10 = vpop.f32.mrb[23].mxu0 }
 0x1c2   : > { %v956_v11 = vpack.c.bf16 %v910_v10, %v907_v7  ;;  %1975 = vmatpush3.bf16.msra.mxu1 %v2653_v14 }
 0x1c3   : > { %1976 = vmatprep.subr.bf16.mxu1 %v2662_v16 }
 0x1c4   : > { %1928 = vmatprep.mubr.bf16.mxu1 %v956_v11 }
 0x1c5   : > { %1929 = vmatmul.mubr.bf16.gmra.mrb[20].mxu1 %v957_v9 }
 0x1c6   : > { %v1902_v12 = vpop.f32.mrb[24].mxu0  ;;  %1977 = vmatpush3.bf16.msra.mxu1 %v2662_v16 }
 0x1c7   : > { %v923_v15 = vpop.f32.mrb[25].mxu0  ;;  %1978 = vmatprep.subr.bf16.mxu1 %v2674_v20 }
 0x1c8   : > { %v1903_v13 = vpop.f32.mrb[26].mxu0 }
 0x1c9   : > { %v959_v17 = vpack.c.bf16 %v1903_v13, %v1902_v12  ;;  %v926_v18 = vpop.f32.mrb[27].mxu0 }
 0x1ca   : > { %v958_v19 = vpack.c.bf16 %v926_v18, %v923_v15  ;;  %1979 = vmatpush3.bf16.msra.mxu1 %v2674_v20 }
 0x1cb   : > { %1980 = vmatprep.subr.bf16.mxu1 %v2682_v22 }
 0x1cc   : > { %1932 = vmatprep.mubr.bf16.mxu1 %v958_v19 }
 0x1cd   : > { %1933 = vmatmul.mubr.bf16.gmra.mrb[24].mxu1 %v959_v17 }
 0x1ce   : > { %v1906_v14 = vpop.f32.mrb[28].mxu0  ;;  %1981 = vmatpush3.bf16.msra.mxu1 %v2682_v22 }
 0x1cf   : > { %v939_v21 = vpop.f32.mrb[29].mxu0  ;;  %1982 = vmatprep.subr.bf16.mxu1 %v2692_v26 }
 0x1d0   : > { %v1907_v16 = vpop.f32.mrb[30].mxu0 }
 0x1d1   : > { %v961_v23 = vpack.c.bf16 %v1907_v16, %v1906_v14  ;;  %v942_v24 = vpop.f32.mrb[31].mxu0 }
 0x1d2   : > { %v960_v25 = vpack.c.bf16 %v942_v24, %v939_v21  ;;  %1983 = vmatpush3.bf16.msra.mxu1 %v2692_v26 }
 0x1d3   : > { %1984 = vmatprep.subr.bf16.mxu1 %v2699_v28 }
 0x1d4   : > { %1936 = vmatprep.mubr.bf16.mxu1 %v960_v25 }
 0x1d5   : > { %1937 = vmatmul.mubr.bf16.gmra.mrb[28].mxu1 %v961_v23 }
 0x1d6   : > { %v1958_v20 = vpop.f32.mrb[32].mxu0  ;;  %1985 = vmatpush3.bf16.msra.mxu1 %v2699_v28 }
 0x1d7   : > { %v1211_v27 = vpop.f32.mrb[33].mxu0  ;;  %1986 = vmatprep.subr.bf16.mxu1 %v2727_v39 }
 0x1d8   : > { %v1959_v22 = vpop.f32.mrb[34].mxu0 }
 0x1d9   : > { %v1275_v29 = vpack.c.bf16 %v1959_v22, %v1958_v20  ;;  %v1214_v30 = vpop.f32.mrb[35].mxu0 }
 0x1da   : > { %v1274_v31 = vpack.c.bf16 %v1214_v30, %v1211_v27  ;;  %1987 = vmatpush3.bf16.msra.mxu1 %v2727_v39 }
 0x1dc   : > { %1988 = vmatprep.mubr.bf16.mxu1 %v1274_v31 }
 0x1dd   : > { %1989 = vmatmul.mubr.bf16.vlgmr.msra.gmra.mrb[32].mxu1 %v1275_v29 }
 0x1de   : > { %v1962_v32 = vpop.f32.mrb[36].mxu0 }
 0x1df   : > { %v1227_v26 = vpop.f32.mrb[37].mxu0 }
 0x1e0   : > { %v1963_v33 = vpop.f32.mrb[38].mxu0 }
 0x1e1   : > { %v1277_v34 = vpack.c.bf16 %v1963_v33, %v1962_v32  ;;  %v1230_v35 = vpop.f32.mrb[39].mxu0 }
 0x1e2   : > { %v1276_v36 = vpack.c.bf16 %v1230_v35, %v1227_v26  ;;  %v2816_v35 = vstv %s1651_s24 }
 0x1e4   : > { %1992 = vmatprep.mubr.bf16.mxu1 %v1276_v36 }
 0x1e5   : > { %1993 = vmatmul.mubr.bf16.gmra.mrb[36].mxu1 %v1277_v34 }
 0x1e6   : > { %v1966_v28 = vpop.f32.mrb[40].mxu0 }
 0x1e7   : > { %v1243_v37 = vpop.f32.mrb[41].mxu0 }
 0x1e8   : > { %v1967_v38 = vpop.f32.mrb[42].mxu0 }
 0x1e9   : > { %v1279_v40 = vpack.c.bf16 %v1967_v38, %v1966_v28  ;;  %v1246_v41 = vpop.f32.mrb[43].mxu0  ;;  %v2820_v28 = vstv %s1652_s27 }
 0x1ea   : > { %v1278_v42 = vpack.c.bf16 %v1246_v41, %v1243_v37 }
 0x1ec   : > { %1996 = vmatprep.mubr.bf16.mxu1 %v1278_v42 }
 0x1ed   : > { %1997 = vmatmul.mubr.bf16.gmra.mrb[40].mxu1 %v1279_v40 }
 0x1ee   : > { %v1970_v39 = vpop.f32.mrb[44].mxu0 }
 0x1ef   : > { %v1259_v43 = vpop.f32.mrb[45].mxu0 }
 0x1f0   : > { %v1971_v44 = vpop.f32.mrb[46].mxu0 }
 0x1f1   : > { %v1281_v45 = vpack.c.bf16 %v1971_v44, %v1970_v39  ;;  %v1262_v46 = vpop.f32.mrb[47].mxu0 }
 0x1f2   : > { %v1280_v47 = vpack.c.bf16 %v1262_v46, %v1259_v43 }
 0x1f4   : > { %2000 = vmatprep.mubr.bf16.mxu1 %v1280_v47 }
 0x1f5   : > { %2001 = vmatmul.mubr.bf16.gmra.mrb[44].mxu1 %v1281_v45 }
 0x270   : > { %v1862_v49 = vpop.f32.mrb[0].mxu1 }
 0x271   : > { %v744_v51 = vsub.f32 %v1862_v49, %v2764_v48  ;;  %v677_v52 = vpop.f32.mrb[1].mxu1 }
 0x272   : > { %v742_v53 = vsub.f32 %v677_v52, %v2764_v48  ;;  %v1863_v54 = vpop.f32.mrb[2].mxu1 }
 0x273   : > { %v762_v55 = vmul.f32 %v2766_v50, %v744_v51  ;;  %v745_v56 = vsub.f32 %v1863_v54, %v2764_v48  ;;  %v680_v57 = vpop.f32.mrb[3].mxu1 }
 0x274   : > { %v760_v58 = vmul.f32 %v2766_v50, %v742_v53  ;;  %v743_v59 = vsub.f32 %v680_v57, %v2764_v48 }
 0x275   : > { %778 = vst [vmem:[%s2774_s9 + $0x10] sm:$0xff] %v762_v55  ;;  %v763_v60 = vmul.f32 %v2766_v50, %v745_v56 }
 0x276   : > { %776 = vst [vmem:[%s2774_s9] sm:$0xff] %v760_v58  ;;  %v761_v61 = vmul.f32 %v2766_v50, %v743_v59 }
 0x277   : > { %779 = vst [vmem:[%s2774_s9 + $0x18] sm:$0xff] %v763_v60 }
 0x278   : > { %777 = vst [vmem:[%s2774_s9 + $0x8] sm:$0xff] %v761_v61  ;;  %v1866_v62 = vpop.f32.mrb[4].mxu1 }
 0x279   : > { %v748_v63 = vsub.f32 %v1866_v62, %v2764_v48  ;;  %v693_v0 = vpop.f32.mrb[5].mxu1 }
 0x27a   : > { %v746_v1 = vsub.f32 %v693_v0, %v2764_v48  ;;  %v1867_v2 = vpop.f32.mrb[6].mxu1 }
 0x27b   : > { %v766_v3 = vmul.f32 %v2766_v50, %v748_v63  ;;  %v749_v4 = vsub.f32 %v1867_v2, %v2764_v48  ;;  %v696_v5 = vpop.f32.mrb[7].mxu1 }
 0x27c   : > { %v764_v6 = vmul.f32 %v2766_v50, %v746_v1  ;;  %v747_v7 = vsub.f32 %v696_v5, %v2764_v48 }
 0x27d   : > { %782 = vst [vmem:[%s2774_s9 + $0x30] sm:$0xff] %v766_v3  ;;  %v767_v8 = vmul.f32 %v2766_v50, %v749_v4 }
 0x27e   : > { %780 = vst [vmem:[%s2774_s9 + $0x20] sm:$0xff] %v764_v6  ;;  %v765_v9 = vmul.f32 %v2766_v50, %v747_v7 }
 0x27f   : > { %783 = vst [vmem:[%s2774_s9 + $0x38] sm:$0xff] %v767_v8 }
 0x280   : > { %781 = vst [vmem:[%s2774_s9 + $0x28] sm:$0xff] %v765_v9  ;;  %v1870_v10 = vpop.f32.mrb[8].mxu1 }
 0x281   : > { %v752_v11 = vsub.f32 %v1870_v10, %v2764_v48  ;;  %v709_v12 = vpop.f32.mrb[9].mxu1 }
 0x282   : > { %v750_v15 = vsub.f32 %v709_v12, %v2764_v48  ;;  %v1871_v13 = vpop.f32.mrb[10].mxu1 }
 0x283   : > { %v770_v17 = vmul.f32 %v2766_v50, %v752_v11  ;;  %v753_v18 = vsub.f32 %v1871_v13, %v2764_v48  ;;  %v712_v19 = vpop.f32.mrb[11].mxu1 }
 0x284   : > { %v768_v14 = vmul.f32 %v2766_v50, %v750_v15  ;;  %v751_v21 = vsub.f32 %v712_v19, %v2764_v48 }
 0x285   : > { %786 = vst [vmem:[%s2774_s9 + $0x50] sm:$0xff] %v770_v17  ;;  %v771_v16 = vmul.f32 %v2766_v50, %v753_v18 }
 0x286   : > { %784 = vst [vmem:[%s2774_s9 + $0x40] sm:$0xff] %v768_v14  ;;  %v769_v23 = vmul.f32 %v2766_v50, %v751_v21 }
 0x287   : > { %787 = vst [vmem:[%s2774_s9 + $0x58] sm:$0xff] %v771_v16  ;;  %v2868_v16 = vstv %s1693_s26 }
 0x288   : > { %785 = vst [vmem:[%s2774_s9 + $0x48] sm:$0xff] %v769_v23  ;;  %v1874_v24 = vpop.f32.mrb[12].mxu1 }
 0x289   : > { %v756_v25 = vsub.f32 %v1874_v24, %v2764_v48  ;;  %v725_v20 = vpop.f32.mrb[13].mxu1  ;;  %v2872_v24 = vstv %s1694_s2 }
 0x28a   : > { %v754_v27 = vsub.f32 %v725_v20, %v2764_v48  ;;  %v1875_v22 = vpop.f32.mrb[14].mxu1 }
 0x28b   : > { %v774_v29 = vmul.f32 %v2766_v50, %v756_v25  ;;  %v757_v30 = vsub.f32 %v1875_v22, %v2764_v48  ;;  %v728_v31 = vpop.f32.mrb[15].mxu1 }
 0x28c   : > { %v772_v32 = vmul.f32 %v2766_v50, %v754_v27  ;;  %v755_v26 = vsub.f32 %v728_v31, %v2764_v48 }
 0x28d   : > { %790 = vst [vmem:[%s2774_s9 + $0x70] sm:$0xff] %v774_v29  ;;  %v775_v33 = vmul.f32 %v2766_v50, %v757_v30 }
 0x28e   : > { %788 = vst [vmem:[%s2774_s9 + $0x60] sm:$0xff] %v772_v32  ;;  %v773_v34 = vmul.f32 %v2766_v50, %v755_v26 }
 0x28f   : > { %791 = vst [vmem:[%s2774_s9 + $0x78] sm:$0xff] %v775_v33 }
 0x290   : > { %789 = vst [vmem:[%s2774_s9 + $0x68] sm:$0xff] %v773_v34  ;;  %v1926_v36 = vpop.f32.mrb[16].mxu1 }
 0x291   : > { %v1063_v37 = vsub.f32 %v1926_v36, %v2816_v35  ;;  %v996_v38 = vpop.f32.mrb[17].mxu1 }
 0x292   : > { %v1061_v40 = vsub.f32 %v996_v38, %v2816_v35  ;;  %v1927_v41 = vpop.f32.mrb[18].mxu1 }
 0x293   : > { %v1081_v42 = vmul.f32 %v2820_v28, %v1063_v37  ;;  %v1064_v39 = vsub.f32 %v1927_v41, %v2816_v35  ;;  %v999_v43 = vpop.f32.mrb[19].mxu1 }
 0x294   : > { %v1079_v44 = vmul.f32 %v2820_v28, %v1061_v40  ;;  %v1062_v45 = vsub.f32 %v999_v43, %v2816_v35 }
 0x295   : > { %1655 = vst [vmem:[%s2774_s9 + $0x90] sm:$0xff] %v1081_v42  ;;  %v1082_v46 = vmul.f32 %v2820_v28, %v1064_v39 }
 0x296   : > { %1653 = vst [vmem:[%s2774_s9 + $0x80] sm:$0xff] %v1079_v44  ;;  %v1080_v47 = vmul.f32 %v2820_v28, %v1062_v45 }
 0x297   : > { %1656 = vst [vmem:[%s2774_s9 + $0x98] sm:$0xff] %v1082_v46 }
 0x298   : > { %1654 = vst [vmem:[%s2774_s9 + $0x88] sm:$0xff] %v1080_v47  ;;  %v1930_v48 = vpop.f32.mrb[20].mxu1 }
 0x299   : > { %v1067_v49 = vsub.f32 %v1930_v48, %v2816_v35  ;;  %v1012_v50 = vpop.f32.mrb[21].mxu1 }
 0x29a   : > { %v1065_v51 = vsub.f32 %v1012_v50, %v2816_v35  ;;  %v1931_v52 = vpop.f32.mrb[22].mxu1 }
 0x29b   : > { %v1085_v53 = vmul.f32 %v2820_v28, %v1067_v49  ;;  %v1068_v54 = vsub.f32 %v1931_v52, %v2816_v35  ;;  %v1015_v55 = vpop.f32.mrb[23].mxu1 }
 0x29c   : > { %v1083_v56 = vmul.f32 %v2820_v28, %v1065_v51  ;;  %v1066_v57 = vsub.f32 %v1015_v55, %v2816_v35 }
 0x29d   : > { %1659 = vst [vmem:[%s2774_s9 + $0xb0] sm:$0xff] %v1085_v53  ;;  %v1086_v58 = vmul.f32 %v2820_v28, %v1068_v54 }
 0x29e   : > { %1657 = vst [vmem:[%s2774_s9 + $0xa0] sm:$0xff] %v1083_v56  ;;  %v1084_v59 = vmul.f32 %v2820_v28, %v1066_v57 }
 0x29f   : > { %1660 = vst [vmem:[%s2774_s9 + $0xb8] sm:$0xff] %v1086_v58 }
 0x2a0   : > { %1658 = vst [vmem:[%s2774_s9 + $0xa8] sm:$0xff] %v1084_v59  ;;  %v1934_v60 = vpop.f32.mrb[24].mxu1 }
 0x2a1   : > { %v1071_v61 = vsub.f32 %v1934_v60, %v2816_v35  ;;  %v1028_v62 = vpop.f32.mrb[25].mxu1 }
 0x2a2   : > { %v1069_v63 = vsub.f32 %v1028_v62, %v2816_v35  ;;  %v1935_v0 = vpop.f32.mrb[26].mxu1 }
 0x2a3   : > { %v1089_v1 = vmul.f32 %v2820_v28, %v1071_v61  ;;  %v1072_v2 = vsub.f32 %v1935_v0, %v2816_v35  ;;  %v1031_v3 = vpop.f32.mrb[27].mxu1 }
 0x2a4   : > { %v1087_v4 = vmul.f32 %v2820_v28, %v1069_v63  ;;  %v1070_v5 = vsub.f32 %v1031_v3, %v2816_v35 }
 0x2a5   : > { %1663 = vst [vmem:[%s2774_s9 + $0xd0] sm:$0xff] %v1089_v1  ;;  %v1090_v6 = vmul.f32 %v2820_v28, %v1072_v2 }
 0x2a6   : > { %1661 = vst [vmem:[%s2774_s9 + $0xc0] sm:$0xff] %v1087_v4  ;;  %v1088_v7 = vmul.f32 %v2820_v28, %v1070_v5 }
 0x2a7   : > { %1664 = vst [vmem:[%s2774_s9 + $0xd8] sm:$0xff] %v1090_v6 }
 0x2a8   : > { %1662 = vst [vmem:[%s2774_s9 + $0xc8] sm:$0xff] %v1088_v7  ;;  %v1938_v8 = vpop.f32.mrb[28].mxu1 }
 0x2a9   : > { %v1075_v9 = vsub.f32 %v1938_v8, %v2816_v35  ;;  %v1044_v10 = vpop.f32.mrb[29].mxu1 }
 0x2aa   : > { %v1073_v11 = vsub.f32 %v1044_v10, %v2816_v35  ;;  %v1939_v12 = vpop.f32.mrb[30].mxu1 }
 0x2ab   : > { %v1093_v15 = vmul.f32 %v2820_v28, %v1075_v9  ;;  %v1076_v13 = vsub.f32 %v1939_v12, %v2816_v35  ;;  %v1047_v17 = vpop.f32.mrb[31].mxu1 }
 0x2ac   : > { %v1091_v18 = vmul.f32 %v2820_v28, %v1073_v11  ;;  %v1074_v19 = vsub.f32 %v1047_v17, %v2816_v35 }
 0x2ad   : > { %1667 = vst [vmem:[%s2774_s9 + $0xf0] sm:$0xff] %v1093_v15  ;;  %v1094_v14 = vmul.f32 %v2820_v28, %v1076_v13 }
 0x2ae   : > { %1665 = vst [vmem:[%s2774_s9 + $0xe0] sm:$0xff] %v1091_v18  ;;  %v1092_v21 = vmul.f32 %v2820_v28, %v1074_v19 }
 0x2af   : > { %1668 = vst [vmem:[%s2774_s9 + $0xf8] sm:$0xff] %v1094_v14 }
 0x2b0   : > { %1666 = vst [vmem:[%s2774_s9 + $0xe8] sm:$0xff] %v1092_v21  ;;  %v1990_v23 = vpop.f32.mrb[32].mxu1 }
 0x2b1   : > { %v1383_v25 = vsub.f32 %v1990_v23, %v2868_v16  ;;  %v1316_v20 = vpop.f32.mrb[33].mxu1 }
 0x2b2   : > { %v1381_v27 = vsub.f32 %v1316_v20, %v2868_v16  ;;  %v1991_v22 = vpop.f32.mrb[34].mxu1 }
 0x2b3   : > { %v1401_v29 = vmul.f32 %v2872_v24, %v1383_v25  ;;  %v1384_v30 = vsub.f32 %v1991_v22, %v2868_v16  ;;  %v1319_v31 = vpop.f32.mrb[35].mxu1 }
 0x2b4   : > { %v1399_v32 = vmul.f32 %v2872_v24, %v1381_v27  ;;  %v1382_v26 = vsub.f32 %v1319_v31, %v2868_v16 }
 0x2b5   : > { %1697 = vst [vmem:[%s2774_s9 + $0x110] sm:$0xff] %v1401_v29  ;;  %v1402_v33 = vmul.f32 %v2872_v24, %v1384_v30 }
 0x2b6   : > { %1695 = vst [vmem:[%s2774_s9 + $0x100] sm:$0xff] %v1399_v32  ;;  %v1400_v34 = vmul.f32 %v2872_v24, %v1382_v26 }
 0x2b7   : > { %1698 = vst [vmem:[%s2774_s9 + $0x118] sm:$0xff] %v1402_v33 }
 0x2b8   : > { %1696 = vst [vmem:[%s2774_s9 + $0x108] sm:$0xff] %v1400_v34  ;;  %v1994_v35 = vpop.f32.mrb[36].mxu1 }
 0x2b9   : > { %v1387_v36 = vsub.f32 %v1994_v35, %v2868_v16  ;;  %v1332_v28 = vpop.f32.mrb[37].mxu1 }
 0x2ba   : > { %v1385_v37 = vsub.f32 %v1332_v28, %v2868_v16  ;;  %v1995_v38 = vpop.f32.mrb[38].mxu1 }
 0x2bb   : > { %v1405_v40 = vmul.f32 %v2872_v24, %v1387_v36  ;;  %v1388_v41 = vsub.f32 %v1995_v38, %v2868_v16  ;;  %v1335_v42 = vpop.f32.mrb[39].mxu1 }
 0x2bc   : > { %v1403_v39 = vmul.f32 %v2872_v24, %v1385_v37  ;;  %v1386_v43 = vsub.f32 %v1335_v42, %v2868_v16 }
 0x2bd   : > { %1701 = vst [vmem:[%s2774_s9 + $0x130] sm:$0xff] %v1405_v40  ;;  %v1406_v44 = vmul.f32 %v2872_v24, %v1388_v41 }
 0x2be   : > { %1699 = vst [vmem:[%s2774_s9 + $0x120] sm:$0xff] %v1403_v39  ;;  %v1404_v45 = vmul.f32 %v2872_v24, %v1386_v43 }
 0x2bf   : > { %1702 = vst [vmem:[%s2774_s9 + $0x138] sm:$0xff] %v1406_v44 }
 0x2c0   : > { %1700 = vst [vmem:[%s2774_s9 + $0x128] sm:$0xff] %v1404_v45  ;;  %v1998_v46 = vpop.f32.mrb[40].mxu1 }
 0x2c1   : > { %v1391_v47 = vsub.f32 %v1998_v46, %v2868_v16  ;;  %v1348_v48 = vpop.f32.mrb[41].mxu1 }
 0x2c2   : > { %v1389_v49 = vsub.f32 %v1348_v48, %v2868_v16  ;;  %v1999_v50 = vpop.f32.mrb[42].mxu1 }
 0x2c3   : > { %v1409_v51 = vmul.f32 %v2872_v24, %v1391_v47  ;;  %v1392_v52 = vsub.f32 %v1999_v50, %v2868_v16  ;;  %v1351_v53 = vpop.f32.mrb[43].mxu1 }
 0x2c4   : > { %v1407_v54 = vmul.f32 %v2872_v24, %v1389_v49  ;;  %v1390_v55 = vsub.f32 %v1351_v53, %v2868_v16 }
 0x2c5   : > { %1705 = vst [vmem:[%s2774_s9 + $0x150] sm:$0xff] %v1409_v51  ;;  %v1410_v56 = vmul.f32 %v2872_v24, %v1392_v52 }
 0x2c6   : > { %1703 = vst [vmem:[%s2774_s9 + $0x140] sm:$0xff] %v1407_v54  ;;  %v1408_v57 = vmul.f32 %v2872_v24, %v1390_v55 }
 0x2c7   : > { %1706 = vst [vmem:[%s2774_s9 + $0x158] sm:$0xff] %v1410_v56 }
 0x2c8   : > { %1704 = vst [vmem:[%s2774_s9 + $0x148] sm:$0xff] %v1408_v57  ;;  %v2002_v58 = vpop.f32.mrb[44].mxu1 }
 0x2c9   : > { %v1395_v59 = vsub.f32 %v2002_v58, %v2868_v16  ;;  %v1364_v60 = vpop.f32.mrb[45].mxu1 }
 0x2ca   : > { %v1393_v61 = vsub.f32 %v1364_v60, %v2868_v16  ;;  %v2003_v62 = vpop.f32.mrb[46].mxu1 }
 0x2cb   : > { %v1413_v63 = vmul.f32 %v2872_v24, %v1395_v59  ;;  %v1396_v0 = vsub.f32 %v2003_v62, %v2868_v16  ;;  %v1367_v1 = vpop.f32.mrb[47].mxu1 }
 0x2cc   : > { %v1411_v2 = vmul.f32 %v2872_v24, %v1393_v61  ;;  %v1394_v3 = vsub.f32 %v1367_v1, %v2868_v16 }
 0x2cd   : > { %1709 = vst [vmem:[%s2774_s9 + $0x170] sm:$0xff] %v1413_v63  ;;  %v1414_v4 = vmul.f32 %v2872_v24, %v1396_v0 }
 0x2ce   : > { %1707 = vst [vmem:[%s2774_s9 + $0x160] sm:$0xff] %v1411_v2  ;;  %v1412_v5 = vmul.f32 %v2872_v24, %v1394_v3 }
 0x2cf   : > { %1710 = vst [vmem:[%s2774_s9 + $0x178] sm:$0xff] %v1414_v4 }
 0x2d0   : > { %1708 = vst [vmem:[%s2774_s9 + $0x168] sm:$0xff] %v1412_v5 }
 0x2d1   : > { %2261 = shalt.err (!%p2258_p2)
}
 0x2d2   : > { %s2262_s28 = scalar_lea.hbm %s2923_s23, 6144  ;;  %s2266_s16 = scalar_lea.hbm %s2978_s5, 12288 }
 0x2d3   : > { %p2263_p8 = scmp.ne.s32.totalorder %s2923_s23, %s2262_s28  ;;  %p2267_p10 = scmp.lt.u32.totalorder %s2923_s23, %s2978_s5 }
 0x2d4   : > { %p2268_p13 = scmp.lt.u32.totalorder %s2266_s16, %s2262_s28  ;;  %p2270_p4 = scmp.lt.u32.totalorder %s2262_s28, %s2923_s23 }
 0x2d5   : > { %p2264_p0 = pnand %p2263_p8, %p3015_p9 }
 0x2d6   : > { %p2269_p6 = por %p2268_p13, %p2267_p10 }
 0x2d7   : > { %p2265_p12 = pneg %p2264_p0 }
 0x2d8   : > { %p2271_p3 = por %p2270_p4, %p2269_p6 }
 0x2da   : > { %p2272_p7 = pnand %p2271_p3, %p2265_p12 }
 0x2dc   : > { %2275 = shalt.err (!%p2272_p7)
}
 0x2dd   : > { %s2336_s9 = smov 128   ;;  %s2337_s24 = smov 8  }
 0x2de   : > { %2023 = dma.vmem_to_hbm [thread:$0]  (%p3015_p9), %s2925_s20, 6144, %s2923_s23, %s1433_s11, %s2336_s9, %s2336_s9, %s2337_s24  }
 0x2df PF: > { %s1461_s27 = sand.u32 1, %s2314_s18   ;;  %p3016_p5 = scmp.ne.s32.totalorder %s3001_s10, 0 }
 0x2e0   : > { %p3017_p11 = scmp.ge.s32.totalorder %s2326_s21, 2  ;;  %s1462_s26 = scalar_lea.sflag [#allocation4], %s1461_s27 }
 0x2e2   : > { %p2043_p1 = pnand %p3017_p11, %p3016_p5 }
 0x2e4   : > { %2309 = dma.done.wait (!%p2043_p1), %s1462_s26, 6144  }
 0x2e5   : > { %2311 = vsyncadd (!%p2043_p1), %s1462_s26, 4294961152  ;;  %s3018_s2 = sld [smem:[#allocation18_spill]]  ;;  %s3019_s20 = sld [smem:[#allocation19_spill]] }
 0x2e6   : > { %p23_p2 = scmp.ge.s32.totalorder %s2389_s22, 4   ;;  %s3020_s18 = smov %s2318_s19 }
 0x2e7   : > { %s3022_s21 = smov %s2389_s22 }
 0x2e8   :  { %25 = sbr.rel (!%p23_p2) target bundleno = 13 (0xd), region = 123 }
 0x2eb   : > { %s3021_s19 = smov %s3018_s2 }
 0x2ef   :  { %1467 = vsyncpa [#allocation3], 1 }
 0x2f0   :  { %1469 = vsyncpa [#allocation3 + $0x1], 1 }
 0x2f1   :  { %1470 = vsyncpa [#allocation10], 1 }
 0x2f2   :  { %1472 = vsyncpa [#allocation10 + $0x1], 1 }
 0x2f3   :  { %1473 = vsyncpa [#allocation4], 1 }
 0x2f4   :  { %1475 = vsyncpa [#allocation4 + $0x1], 1 }
 0x2f5   :  { %1476 = vsyncpa [#allocation5], 1 }
 0x2f6   :  { %1478 = vsyncpa [#allocation5 + $0x1], 1 }
 0x2f7   :  { %1479 = vsyncpa [#allocation6], 1 }
 0x2f8   :  { %1481 = vsyncpa [#allocation6 + $0x1], 1 }

</bundles_post_ra>
